<compile_context>
chip_gen: v7x
topology: tpu7x:2x2x1
jax: 0.10.0
libtpu: 0.0.40
codegen_flags: <defaults>
</compile_context>

<pallas_src>
import math

import jax
import jax.numpy as jnp
from jax import lax
from jax.experimental import pallas as pl
from jax.experimental.pallas import tpu as pltpu

NUM_LAYERS = 2
D_MODEL = 8          # == input_size
NUM_HEADS = 2
D_FF = 16
HEAD_SIZE = D_MODEL // NUM_HEADS
EPS = 1e-6
NEG_INF = -1e9

# ---- packed parameter slab layout (every block starts at a multiple of 8 rows) ----
ROWS_PER_LAYER = 48            # wqkv(8) + wo(8) + w1(8) + w2(16) + bias block(8)
OFF_WQKV = 0                   # (D, 3D)   lanes 0:24
OFF_WO = 8                     # (D, D)    lanes 0:8
OFF_W1 = 16                    # (D, F)    lanes 0:16
OFF_W2 = 24                    # (F, D)    lanes 0:8   (16 rows)
OFF_BIAS = 40                  # 8 rows: bqkv, bo, b1, b2, g1, be1, g2, be2
DEC_BASE = NUM_LAYERS * ROWS_PER_LAYER     # 96 : decoder weight, (D, 128), lane 0 real
MISC_BASE = DEC_BASE + 8                   # 104: row0 decoder bias; rows 1..2 q-masks
                                           #      (scale folded); rows 3..4 v-masks
POOL_BASE = MISC_BASE + 8                  # 112: (8, B*S) pooling matrix (rows B..7 zero)
AMASK_BASE = POOL_BASE + 8                 # 120: (H*B*S, B*S) additive batch mask
SLAB_COLS = 128
OUT_ROWS = 8                               # padded output sublanes (unmasked store)


def _layernorm(x, gamma, beta):
    # Matches the custom PyTorch LayerNorm: unbiased std (divide by D-1).
    # 1/(std + 1e-6) is replaced by rsqrt(var + 1e-12); relative difference is
    # ~1e-6 for std ~ O(1), far inside the 2e-3 self-check tolerance.
    d = x.shape[-1]
    mean = jnp.sum(x, axis=-1, keepdims=True) * (1.0 / d)
    xc = x - mean
    var = jnp.sum(xc * xc, axis=-1, keepdims=True) * (1.0 / (d - 1))
    inv = lax.rsqrt(var + 1e-12)
    return xc * inv * gamma + beta


def transformer_kernel(x_ref, p_ref, out_ref):
    BS, D = x_ref.shape            # (B*S, D): batch*seq already flattened on host
    H = NUM_HEADS

    x2 = x_ref[...]                # stays 2-D for the whole layer stack

    # precomputed constants (one 8-row block + the batch mask), from the slab
    misc = p_ref[MISC_BASE:MISC_BASE + 8, :]                    # (8, 128)
    bd = misc[0:1, :]                                           # decoder bias (1, 128)
    qm = [misc[1 + h:2 + h, 0:D] for h in range(H)]             # head masks * 1/sqrt(hs)
    vm = [misc[1 + H + h:2 + H + h, 0:D] for h in range(H)]     # head masks
    amask = p_ref[AMASK_BASE:AMASK_BASE + H * BS, 0:BS]         # (H*BS, BS), 0 / -1e9

    for l in range(NUM_LAYERS):                                 # static layer loop
        base = l * ROWS_PER_LAYER
        wqkv = p_ref[base + OFF_WQKV: base + OFF_WQKV + D, 0:3 * D]       # (D, 3D)
        wo = p_ref[base + OFF_WO: base + OFF_WO + D, 0:D]                 # (D, D)
        w1 = p_ref[base + OFF_W1: base + OFF_W1 + D, 0:D_FF]              # (D, F)
        w2 = p_ref[base + OFF_W2: base + OFF_W2 + D_FF, 0:D]              # (F, D)
        bias_blk = p_ref[base + OFF_BIAS: base + OFF_BIAS + 8, 0:3 * D]   # (8, 3D)
        bqkv = bias_blk[0:1, 0:3 * D]
        bo = bias_blk[1:2, 0:D]
        b1 = bias_blk[2:3, 0:D_FF]
        b2 = bias_blk[3:4, 0:D]
        g1 = bias_blk[4:5, 0:D]
        be1 = bias_blk[5:6, 0:D]
        g2 = bias_blk[6:7, 0:D]
        be2 = bias_blk[7:8, 0:D]

        # ---- fused QKV projection over all batch*seq rows (one fat matmul) ----
        qkv = jnp.dot(x2, wqkv, preferred_element_type=jnp.float32) + bqkv  # (BS, 3D)
        q2 = qkv[:, 0:D]
        k2 = qkv[:, D:2 * D]
        v2 = qkv[:, 2 * D:3 * D]

        # ---- attention with heads+batch folded into sublanes (mask=None path) ----
        # stacked, head-masked queries: rows [h*BS + b*S + sq]
        qs = jnp.concatenate([q2 * qm[h] for h in range(H)], axis=0)        # (H*BS, D)
        # one score matmul per layer; Mosaic materializes a single rhs transpose
        s = lax.dot_general(qs, k2, (((1,), (1,)), ((), ())),
                            preferred_element_type=jnp.float32)             # (H*BS, BS)
        s = s + amask                       # block-diag batch mask BEFORE max/exp
        s = s - jnp.max(s, axis=-1, keepdims=True)
        p = jnp.exp(s)
        p = p * pl.reciprocal(jnp.sum(p, axis=-1, keepdims=True), approx=True)
        pv = jnp.dot(p, v2, preferred_element_type=jnp.float32)             # (H*BS, D)
        # per-head value mask + fold the head groups back to the concat layout
        attn = pv[0:BS, :] * vm[0]
        for h in range(1, H):
            attn = attn + pv[h * BS:(h + 1) * BS, :] * vm[h]                # (BS, D)

        # dropout is identity at inference
        x2 = x2 + jnp.dot(attn, wo, preferred_element_type=jnp.float32) + bo
        x2 = _layernorm(x2, g1, be1)

        # ---- position-wise feedforward (flattened over batch*seq) ----
        hdn = jnp.maximum(
            jnp.dot(x2, w1, preferred_element_type=jnp.float32) + b1, 0.0)
        ff = jnp.dot(hdn, w2, preferred_element_type=jnp.float32) + b2
        x2 = _layernorm(x2 + ff, g2, be2)

    # ---- seq-mean pooling via precomputed (8, BS) matrix, then decoder ----
    pool = p_ref[POOL_BASE:POOL_BASE + OUT_ROWS, 0:BS]            # rows B..7 are zero
    pooled = jnp.dot(pool, x2, preferred_element_type=jnp.float32)          # (8, D)
    wd = p_ref[DEC_BASE:DEC_BASE + D, :]                          # (D, 128), lane 0 real
    out_ref[...] = jnp.dot(pooled, wd, preferred_element_type=jnp.float32) + bd


def transformer_forward(x, slab):
    """x: (B, S, D) f32; slab: packed parameters (152, 128). Returns (B, 1)."""
    B, S, D = x.shape
    assert D == D_MODEL and B <= OUT_ROWS
    BS = B * S
    x2 = x.reshape(BS, D)                          # flatten on host; kernel stays 2-D
    flops = (2 * NUM_LAYERS * BS * D * (3 * D + D + 2 * D_FF)       # qkv/out/ffn
             + 2 * NUM_LAYERS * (NUM_HEADS * BS) * BS * 2 * D       # scores + PV
             + 2 * OUT_ROWS * BS * D + 2 * OUT_ROWS * D * SLAB_COLS)
    out = pl.pallas_call(
        transformer_kernel,
        out_shape=jax.ShapeDtypeStruct((OUT_ROWS, SLAB_COLS), jnp.float32),
        in_specs=[pl.BlockSpec(memory_space=pltpu.MemorySpace.VMEM),
                  pl.BlockSpec(memory_space=pltpu.MemorySpace.VMEM)],
        out_specs=pl.BlockSpec(memory_space=pltpu.MemorySpace.VMEM),
        cost_estimate=pl.CostEstimate(
            flops=flops,
            transcendentals=NUM_LAYERS * (NUM_HEADS * BS * BS + 4 * BS),
            bytes_accessed=x2.size * 4 + slab.size * 4 + OUT_ROWS * SLAB_COLS * 4),
    )(x2, slab)
    return out[:B, :1]   # lane/sublane-dense kernel output; slice back on host


# ---------------- deterministic parameter construction ----------------
def make_params(key):
    keys = jax.random.split(key, 12)
    L, D, F = NUM_LAYERS, D_MODEL, D_FF

    def w(k, shape, fan_in):
        return jax.random.normal(k, shape, jnp.float32) / math.sqrt(fan_in)

    wq = w(keys[0], (L, D, D), D)
    wk = w(keys[1], (L, D, D), D)
    wv = w(keys[2], (L, D, D), D)
    wo = w(keys[3], (L, D, D), D)
    bq = w(keys[4], (L, 1, D), D)
    bk = w(keys[5], (L, 1, D), D)
    bv = w(keys[6], (L, 1, D), D)
    bo = w(keys[7], (L, 1, D), D)
    w1 = w(keys[8], (L, D, F), D)
    b1 = w(keys[9], (L, 1, F), D)
    w2 = w(keys[10], (L, F, D), F)
    b2 = jnp.zeros((L, 1, D), jnp.float32)
    g1 = jnp.ones((L, 1, D), jnp.float32)
    be1 = jnp.zeros((L, 1, D), jnp.float32)
    g2 = jnp.ones((L, 1, D), jnp.float32)
    be2 = jnp.zeros((L, 1, D), jnp.float32)
    wd = w(keys[11], (D, 1), D)
    bd = jnp.zeros((1, 1), jnp.float32)
    return [wq, bq, wk, bk, wv, bv, wo, bo,
            w1, b1, w2, b2, g1, be1, g2, be2, wd, bd]


def pack_params(params, batch, seq):
    """Pack all parameters + precomputed masks/pool matrix into one f32 slab."""
    (wq, bq, wk, bk, wv, bv, wo, bo,
     w1, b1, w2, b2, g1, be1, g2, be2, wd, bd) = params
    D, F, H, HS = D_MODEL, D_FF, NUM_HEADS, HEAD_SIZE
    BS = batch * seq
    slab_rows = AMASK_BASE + H * BS                      # 152 for B=2, S=8
    slab = jnp.zeros((slab_rows, SLAB_COLS), jnp.float32)

    for l in range(NUM_LAYERS):
        base = l * ROWS_PER_LAYER
        wqkv = jnp.concatenate([wq[l], wk[l], wv[l]], axis=1)        # (D, 3D)
        bqkv = jnp.concatenate([bq[l], bk[l], bv[l]], axis=1)        # (1, 3D)
        slab = slab.at[base + OFF_WQKV: base + OFF_WQKV + D, 0:3 * D].set(wqkv)
        slab = slab.at[base + OFF_WO: base + OFF_WO + D, 0:D].set(wo[l])
        slab = slab.at[base + OFF_W1: base + OFF_W1 + D, 0:F].set(w1[l])
        slab = slab.at[base + OFF_W2: base + OFF_W2 + F, 0:D].set(w2[l])
        slab = slab.at[base + OFF_BIAS + 0, 0:3 * D].set(bqkv[0])
        slab = slab.at[base + OFF_BIAS + 1, 0:D].set(bo[l][0])
        slab = slab.at[base + OFF_BIAS + 2, 0:F].set(b1[l][0])
        slab = slab.at[base + OFF_BIAS + 3, 0:D].set(b2[l][0])
        slab = slab.at[base + OFF_BIAS + 4, 0:D].set(g1[l][0])
        slab = slab.at[base + OFF_BIAS + 5, 0:D].set(be1[l][0])
        slab = slab.at[base + OFF_BIAS + 6, 0:D].set(g2[l][0])
        slab = slab.at[base + OFF_BIAS + 7, 0:D].set(be2[l][0])

    # decoder weight/bias (lanes 1..127 stay exactly zero)
    slab = slab.at[DEC_BASE:DEC_BASE + D, 0:1].set(wd)
    slab = slab.at[MISC_BASE, 0:1].set(bd[0])

    # per-head lane masks: q-mask has the 1/sqrt(head_size) scale folded in
    scale = 1.0 / math.sqrt(HS)
    lane = jnp.arange(D)
    for h in range(H):
        m = ((lane >= h * HS) & (lane < (h + 1) * HS)).astype(jnp.float32)
        slab = slab.at[MISC_BASE + 1 + h, 0:D].set(m * scale)
        slab = slab.at[MISC_BASE + 1 + H + h, 0:D].set(m)

    # pooling matrix: row i (< batch) averages that batch's seq positions
    prow = jnp.arange(OUT_ROWS)[:, None]
    pcol = jnp.arange(BS)[None, :]
    pool = jnp.where((pcol // seq) == prow, 1.0 / seq, 0.0).astype(jnp.float32)
    slab = slab.at[POOL_BASE:POOL_BASE + OUT_ROWS, 0:BS].set(pool)

    # block-diagonal additive batch mask for the head/batch-stacked scores:
    # row r = h*BS + b*seq + sq may only see key columns of the same batch b.
    r = jnp.arange(H * BS)[:, None]
    c = jnp.arange(BS)[None, :]
    amask = jnp.where(((r % BS) // seq) == (c // seq), 0.0, NEG_INF)
    slab = slab.at[AMASK_BASE:AMASK_BASE + H * BS, 0:BS].set(
        amask.astype(jnp.float32))
    return slab


# ---------------- pure-JAX reference (mirrors the PyTorch forward) ----------------
def reference_forward(x, params):
    (wq, bq, wk, bk, wv, bv, wo, bo,
     w1, b1, w2, b2, g1, be1, g2, be2, wd, bd) = params
    B, S, D = x.shape

    def ln(x, g, be):
        mean = jnp.mean(x, axis=-1, keepdims=True)
        xc = x - mean
        std = jnp.sqrt(jnp.sum(xc * xc, axis=-1, keepdims=True) / (D - 1))
        return xc / (std + EPS) * g + be

    for l in range(NUM_LAYERS):
        q = (x @ wq[l] + bq[l]).reshape(B, S, NUM_HEADS, HEAD_SIZE).transpose(0, 2, 1, 3)
        k = (x @ wk[l] + bk[l]).reshape(B, S, NUM_HEADS, HEAD_SIZE).transpose(0, 2, 1, 3)
        v = (x @ wv[l] + bv[l]).reshape(B, S, NUM_HEADS, HEAD_SIZE).transpose(0, 2, 1, 3)
        s = jnp.einsum("bhqd,bhkd->bhqk", q, k) / math.sqrt(HEAD_SIZE)
        p = jax.nn.softmax(s, axis=-1)
        a = jnp.einsum("bhqk,bhkd->bhqd", p, v).transpose(0, 2, 1, 3).reshape(B, S, D)
        x = ln(x + (a @ wo[l] + bo[l]), g1[l], be1[l])
        ff = jnp.maximum(x @ w1[l] + b1[l], 0.0) @ w2[l] + b2[l]
        x = ln(x + ff, g2[l], be2[l])
    return x.mean(axis=1) @ wd + bd


if __name__ == "__main__":
    key = jax.random.PRNGKey(0)
    kx, kp = jax.random.split(key)

    B, S = 2, 8                       # batch=2, seq=8, d_model=8
    x = jax.random.normal(kx, (B, S, D_MODEL), jnp.float32)
    params = make_params(kp)
    slab = pack_params(params, B, S)

    out = transformer_forward(x, slab)
    out = jax.block_until_ready(out)

    ref = reference_forward(x, params)
    assert out.shape == (B, 1), out.shape
    # tolerance 2e-3 accounts for pl.reciprocal(approx=True) in softmax and the
    # rsqrt(var + 1e-12) vs 1/(std + 1e-6) LayerNorm substitution.
    assert jnp.allclose(out, ref, atol=2e-3, rtol=2e-3), (out, ref)

    print("KERNEL_OK")
</pallas_src>

<mosaic_0001>
module attributes {stable_mosaic.version = 11 : i64} {
  func.func @transformer_kernel(%arg0: memref<16x8xf32, #tpu.memory_space<vmem>>, %arg1: memref<152x128xf32, #tpu.memory_space<vmem>>, %arg2: memref<8x128xf32, #tpu.memory_space<vmem>>) attributes {dimension_semantics = [], scalar_prefetch = 0 : i64, scratch_operands = 0 : i64, tpu.core_type = #tpu.core_type<tc>} {
    %c0 = arith.constant 0 : index
    %c0_0 = arith.constant 0 : index
    %0 = vector.load %arg0[%c0, %c0_0] : memref<16x8xf32, #tpu.memory_space<vmem>>, vector<16x8xf32>
    %c104 = arith.constant 104 : index
    %c0_1 = arith.constant 0 : index
    %1 = vector.load %arg1[%c104, %c0_1] : memref<152x128xf32, #tpu.memory_space<vmem>>, vector<8x128xf32>
    %2 = vector.extract_strided_slice %1 {offsets = [0, 0], sizes = [1, 128], strides = [1, 1]} : vector<8x128xf32> to vector<1x128xf32>
    %3 = vector.extract_strided_slice %1 {offsets = [1, 0], sizes = [1, 8], strides = [1, 1]} : vector<8x128xf32> to vector<1x8xf32>
    %4 = vector.extract_strided_slice %1 {offsets = [2, 0], sizes = [1, 8], strides = [1, 1]} : vector<8x128xf32> to vector<1x8xf32>
    %5 = vector.extract_strided_slice %1 {offsets = [3, 0], sizes = [1, 8], strides = [1, 1]} : vector<8x128xf32> to vector<1x8xf32>
    %6 = vector.extract_strided_slice %1 {offsets = [4, 0], sizes = [1, 8], strides = [1, 1]} : vector<8x128xf32> to vector<1x8xf32>
    %c120 = arith.constant 120 : index
    %c0_2 = arith.constant 0 : index
    %7 = vector.load %arg1[%c120, %c0_2] : memref<152x128xf32, #tpu.memory_space<vmem>>, vector<32x16xf32>
    %c0_3 = arith.constant 0 : index
    %c0_4 = arith.constant 0 : index
    %8 = vector.load %arg1[%c0_3, %c0_4] : memref<152x128xf32, #tpu.memory_space<vmem>>, vector<8x24xf32>
    %c8 = arith.constant 8 : index
    %c0_5 = arith.constant 0 : index
    %9 = vector.load %arg1[%c8, %c0_5] : memref<152x128xf32, #tpu.memory_space<vmem>>, vector<8x8xf32>
    %c16 = arith.constant 16 : index
    %c0_6 = arith.constant 0 : index
    %10 = vector.load %arg1[%c16, %c0_6] : memref<152x128xf32, #tpu.memory_space<vmem>>, vector<8x16xf32>
    %c24 = arith.constant 24 : index
    %c0_7 = arith.constant 0 : index
    %11 = vector.load %arg1[%c24, %c0_7] : memref<152x128xf32, #tpu.memory_space<vmem>>, vector<16x8xf32>
    %c40 = arith.constant 40 : index
    %c0_8 = arith.constant 0 : index
    %12 = vector.load %arg1[%c40, %c0_8] : memref<152x128xf32, #tpu.memory_space<vmem>>, vector<8x24xf32>
    %13 = vector.extract_strided_slice %12 {offsets = [0, 0], sizes = [1, 24], strides = [1, 1]} : vector<8x24xf32> to vector<1x24xf32>
    %14 = vector.extract_strided_slice %12 {offsets = [1, 0], sizes = [1, 8], strides = [1, 1]} : vector<8x24xf32> to vector<1x8xf32>
    %15 = vector.extract_strided_slice %12 {offsets = [2, 0], sizes = [1, 16], strides = [1, 1]} : vector<8x24xf32> to vector<1x16xf32>
    %16 = vector.extract_strided_slice %12 {offsets = [3, 0], sizes = [1, 8], strides = [1, 1]} : vector<8x24xf32> to vector<1x8xf32>
    %17 = vector.extract_strided_slice %12 {offsets = [4, 0], sizes = [1, 8], strides = [1, 1]} : vector<8x24xf32> to vector<1x8xf32>
    %18 = vector.extract_strided_slice %12 {offsets = [5, 0], sizes = [1, 8], strides = [1, 1]} : vector<8x24xf32> to vector<1x8xf32>
    %19 = vector.extract_strided_slice %12 {offsets = [6, 0], sizes = [1, 8], strides = [1, 1]} : vector<8x24xf32> to vector<1x8xf32>
    %20 = vector.extract_strided_slice %12 {offsets = [7, 0], sizes = [1, 8], strides = [1, 1]} : vector<8x24xf32> to vector<1x8xf32>
    %cst = arith.constant dense<0.000000e+00> : vector<16x24xf32>
    %21 = tpu.matmul %0, %8, %cst {dimension_numbers = #tpu.dot_dimension_numbers<[1], [0], [0], [1], [0, 0, 1, 1], [], []>} : vector<16x8xf32>, vector<8x24xf32>, vector<16x24xf32> -> vector<16x24xf32>
    %22 = vector.broadcast %13 : vector<1x24xf32> to vector<16x24xf32>
    %23 = arith.addf %21, %22 : vector<16x24xf32>
    %24 = vector.extract_strided_slice %23 {offsets = [0, 0], sizes = [16, 8], strides = [1, 1]} : vector<16x24xf32> to vector<16x8xf32>
    %25 = vector.extract_strided_slice %23 {offsets = [0, 8], sizes = [16, 8], strides = [1, 1]} : vector<16x24xf32> to vector<16x8xf32>
    %26 = vector.extract_strided_slice %23 {offsets = [0, 16], sizes = [16, 8], strides = [1, 1]} : vector<16x24xf32> to vector<16x8xf32>
    %27 = vector.broadcast %3 : vector<1x8xf32> to vector<16x8xf32>
    %28 = arith.mulf %24, %27 : vector<16x8xf32>
    %29 = vector.broadcast %4 : vector<1x8xf32> to vector<16x8xf32>
    %30 = arith.mulf %24, %29 : vector<16x8xf32>
    %31 = tpu.concatenate %28, %30 in 0 : vector<16x8xf32>, vector<16x8xf32> -> vector<32x8xf32>
    %cst_9 = arith.constant dense<0.000000e+00> : vector<32x16xf32>
    %32 = tpu.matmul %31, %25, %cst_9 {dimension_numbers = #tpu.dot_dimension_numbers<[1], [1], [0], [0], [0, 0, 1, 0], [], []>} : vector<32x8xf32>, vector<16x8xf32>, vector<32x16xf32> -> vector<32x16xf32>
    %33 = arith.addf %32, %7 : vector<32x16xf32>
    %cst_10 = arith.constant dense<0xFF800000> : vector<32xf32>
    %34 = vector.multi_reduction <maximumf>, %33, %cst_10 [1] : vector<32x16xf32> to vector<32xf32>
    %35 = vector.shape_cast %34 : vector<32xf32> to vector<32x1xf32>
    %36 = vector.broadcast %35 : vector<32x1xf32> to vector<32x16xf32>
    %37 = arith.subf %33, %36 : vector<32x16xf32>
    %38 = math.exp %37 : vector<32x16xf32>
    %cst_11 = arith.constant dense<0.000000e+00> : vector<32xf32>
    %39 = vector.multi_reduction <add>, %38, %cst_11 [1] : vector<32x16xf32> to vector<32xf32>
    %40 = vector.shape_cast %39 : vector<32xf32> to vector<32x1xf32>
    %41 = tpu.reciprocal %40 {approx = true} : vector<32x1xf32> -> vector<32x1xf32>
    %42 = vector.broadcast %41 : vector<32x1xf32> to vector<32x16xf32>
    %43 = arith.mulf %38, %42 : vector<32x16xf32>
    %cst_12 = arith.constant dense<0.000000e+00> : vector<32x8xf32>
    %44 = tpu.matmul %43, %26, %cst_12 {dimension_numbers = #tpu.dot_dimension_numbers<[1], [0], [0], [1], [0, 0, 1, 1], [], []>} : vector<32x16xf32>, vector<16x8xf32>, vector<32x8xf32> -> vector<32x8xf32>
    %45 = vector.extract_strided_slice %44 {offsets = [0, 0], sizes = [16, 8], strides = [1, 1]} : vector<32x8xf32> to vector<16x8xf32>
    %46 = vector.broadcast %5 : vector<1x8xf32> to vector<16x8xf32>
    %47 = arith.mulf %45, %46 : vector<16x8xf32>
    %48 = vector.extract_strided_slice %44 {offsets = [16, 0], sizes = [16, 8], strides = [1, 1]} : vector<32x8xf32> to vector<16x8xf32>
    %49 = vector.broadcast %6 : vector<1x8xf32> to vector<16x8xf32>
    %50 = arith.mulf %48, %49 : vector<16x8xf32>
    %51 = arith.addf %47, %50 : vector<16x8xf32>
    %cst_13 = arith.constant dense<0.000000e+00> : vector<16x8xf32>
    %52 = tpu.matmul %51, %9, %cst_13 {dimension_numbers = #tpu.dot_dimension_numbers<[1], [0], [0], [1], [0, 0, 1, 1], [], []>} : vector<16x8xf32>, vector<8x8xf32>, vector<16x8xf32> -> vector<16x8xf32>
    %53 = arith.addf %0, %52 : vector<16x8xf32>
    %54 = vector.broadcast %14 : vector<1x8xf32> to vector<16x8xf32>
    %55 = arith.addf %53, %54 : vector<16x8xf32>
    %cst_14 = arith.constant dense<0.000000e+00> : vector<16xf32>
    %56 = vector.multi_reduction <add>, %55, %cst_14 [1] : vector<16x8xf32> to vector<16xf32>
    %57 = vector.shape_cast %56 : vector<16xf32> to vector<16x1xf32>
    %cst_15 = arith.constant 1.250000e-01 : f32
    %58 = vector.broadcast %cst_15 : f32 to vector<16x1xf32>
    %59 = arith.mulf %57, %58 : vector<16x1xf32>
    %60 = vector.broadcast %59 : vector<16x1xf32> to vector<16x8xf32>
    %61 = arith.subf %55, %60 : vector<16x8xf32>
    %62 = arith.mulf %61, %61 : vector<16x8xf32>
    %cst_16 = arith.constant dense<0.000000e+00> : vector<16xf32>
    %63 = vector.multi_reduction <add>, %62, %cst_16 [1] : vector<16x8xf32> to vector<16xf32>
    %64 = vector.shape_cast %63 : vector<16xf32> to vector<16x1xf32>
    %cst_17 = arith.constant 0.142857149 : f32
    %65 = vector.broadcast %cst_17 : f32 to vector<16x1xf32>
    %66 = arith.mulf %64, %65 : vector<16x1xf32>
    %cst_18 = arith.constant 9.99999996E-13 : f32
    %67 = vector.broadcast %cst_18 : f32 to vector<16x1xf32>
    %68 = arith.addf %66, %67 : vector<16x1xf32>
    %69 = math.rsqrt %68 : vector<16x1xf32>
    %70 = vector.broadcast %69 : vector<16x1xf32> to vector<16x8xf32>
    %71 = arith.mulf %61, %70 : vector<16x8xf32>
    %72 = vector.broadcast %17 : vector<1x8xf32> to vector<16x8xf32>
    %73 = arith.mulf %71, %72 : vector<16x8xf32>
    %74 = vector.broadcast %18 : vector<1x8xf32> to vector<16x8xf32>
    %75 = arith.addf %73, %74 : vector<16x8xf32>
    %cst_19 = arith.constant dense<0.000000e+00> : vector<16x16xf32>
    %76 = tpu.matmul %75, %10, %cst_19 {dimension_numbers = #tpu.dot_dimension_numbers<[1], [0], [0], [1], [0, 0, 1, 1], [], []>} : vector<16x8xf32>, vector<8x16xf32>, vector<16x16xf32> -> vector<16x16xf32>
    %77 = vector.broadcast %15 : vector<1x16xf32> to vector<16x16xf32>
    %78 = arith.addf %76, %77 : vector<16x16xf32>
    %cst_20 = arith.constant 0.000000e+00 : f32
    %79 = vector.broadcast %cst_20 : f32 to vector<16x16xf32>
    %80 = arith.maximumf %78, %79 : vector<16x16xf32>
    %cst_21 = arith.constant dense<0.000000e+00> : vector<16x8xf32>
    %81 = tpu.matmul %80, %11, %cst_21 {dimension_numbers = #tpu.dot_dimension_numbers<[1], [0], [0], [1], [0, 0, 1, 1], [], []>} : vector<16x16xf32>, vector<16x8xf32>, vector<16x8xf32> -> vector<16x8xf32>
    %82 = vector.broadcast %16 : vector<1x8xf32> to vector<16x8xf32>
    %83 = arith.addf %81, %82 : vector<16x8xf32>
    %84 = arith.addf %75, %83 : vector<16x8xf32>
    %cst_22 = arith.constant dense<0.000000e+00> : vector<16xf32>
    %85 = vector.multi_reduction <add>, %84, %cst_22 [1] : vector<16x8xf32> to vector<16xf32>
    %86 = vector.shape_cast %85 : vector<16xf32> to vector<16x1xf32>
    %cst_23 = arith.constant 1.250000e-01 : f32
    %87 = vector.broadcast %cst_23 : f32 to vector<16x1xf32>
    %88 = arith.mulf %86, %87 : vector<16x1xf32>
    %89 = vector.broadcast %88 : vector<16x1xf32> to vector<16x8xf32>
    %90 = arith.subf %84, %89 : vector<16x8xf32>
    %91 = arith.mulf %90, %90 : vector<16x8xf32>
    %cst_24 = arith.constant dense<0.000000e+00> : vector<16xf32>
    %92 = vector.multi_reduction <add>, %91, %cst_24 [1] : vector<16x8xf32> to vector<16xf32>
    %93 = vector.shape_cast %92 : vector<16xf32> to vector<16x1xf32>
    %cst_25 = arith.constant 0.142857149 : f32
    %94 = vector.broadcast %cst_25 : f32 to vector<16x1xf32>
    %95 = arith.mulf %93, %94 : vector<16x1xf32>
    %cst_26 = arith.constant 9.99999996E-13 : f32
    %96 = vector.broadcast %cst_26 : f32 to vector<16x1xf32>
    %97 = arith.addf %95, %96 : vector<16x1xf32>
    %98 = math.rsqrt %97 : vector<16x1xf32>
    %99 = vector.broadcast %98 : vector<16x1xf32> to vector<16x8xf32>
    %100 = arith.mulf %90, %99 : vector<16x8xf32>
    %101 = vector.broadcast %19 : vector<1x8xf32> to vector<16x8xf32>
    %102 = arith.mulf %100, %101 : vector<16x8xf32>
    %103 = vector.broadcast %20 : vector<1x8xf32> to vector<16x8xf32>
    %104 = arith.addf %102, %103 : vector<16x8xf32>
    %c48 = arith.constant 48 : index
    %c0_27 = arith.constant 0 : index
    %105 = vector.load %arg1[%c48, %c0_27] : memref<152x128xf32, #tpu.memory_space<vmem>>, vector<8x24xf32>
    %c56 = arith.constant 56 : index
    %c0_28 = arith.constant 0 : index
    %106 = vector.load %arg1[%c56, %c0_28] : memref<152x128xf32, #tpu.memory_space<vmem>>, vector<8x8xf32>
    %c64 = arith.constant 64 : index
    %c0_29 = arith.constant 0 : index
    %107 = vector.load %arg1[%c64, %c0_29] : memref<152x128xf32, #tpu.memory_space<vmem>>, vector<8x16xf32>
    %c72 = arith.constant 72 : index
    %c0_30 = arith.constant 0 : index
    %108 = vector.load %arg1[%c72, %c0_30] : memref<152x128xf32, #tpu.memory_space<vmem>>, vector<16x8xf32>
    %c88 = arith.constant 88 : index
    %c0_31 = arith.constant 0 : index
    %109 = vector.load %arg1[%c88, %c0_31] : memref<152x128xf32, #tpu.memory_space<vmem>>, vector<8x24xf32>
    %110 = vector.extract_strided_slice %109 {offsets = [0, 0], sizes = [1, 24], strides = [1, 1]} : vector<8x24xf32> to vector<1x24xf32>
    %111 = vector.extract_strided_slice %109 {offsets = [1, 0], sizes = [1, 8], strides = [1, 1]} : vector<8x24xf32> to vector<1x8xf32>
    %112 = vector.extract_strided_slice %109 {offsets = [2, 0], sizes = [1, 16], strides = [1, 1]} : vector<8x24xf32> to vector<1x16xf32>
    %113 = vector.extract_strided_slice %109 {offsets = [3, 0], sizes = [1, 8], strides = [1, 1]} : vector<8x24xf32> to vector<1x8xf32>
    %114 = vector.extract_strided_slice %109 {offsets = [4, 0], sizes = [1, 8], strides = [1, 1]} : vector<8x24xf32> to vector<1x8xf32>
    %115 = vector.extract_strided_slice %109 {offsets = [5, 0], sizes = [1, 8], strides = [1, 1]} : vector<8x24xf32> to vector<1x8xf32>
    %116 = vector.extract_strided_slice %109 {offsets = [6, 0], sizes = [1, 8], strides = [1, 1]} : vector<8x24xf32> to vector<1x8xf32>
    %117 = vector.extract_strided_slice %109 {offsets = [7, 0], sizes = [1, 8], strides = [1, 1]} : vector<8x24xf32> to vector<1x8xf32>
    %cst_32 = arith.constant dense<0.000000e+00> : vector<16x24xf32>
    %118 = tpu.matmul %104, %105, %cst_32 {dimension_numbers = #tpu.dot_dimension_numbers<[1], [0], [0], [1], [0, 0, 1, 1], [], []>} : vector<16x8xf32>, vector<8x24xf32>, vector<16x24xf32> -> vector<16x24xf32>
    %119 = vector.broadcast %110 : vector<1x24xf32> to vector<16x24xf32>
    %120 = arith.addf %118, %119 : vector<16x24xf32>
    %121 = vector.extract_strided_slice %120 {offsets = [0, 0], sizes = [16, 8], strides = [1, 1]} : vector<16x24xf32> to vector<16x8xf32>
    %122 = vector.extract_strided_slice %120 {offsets = [0, 8], sizes = [16, 8], strides = [1, 1]} : vector<16x24xf32> to vector<16x8xf32>
    %123 = vector.extract_strided_slice %120 {offsets = [0, 16], sizes = [16, 8], strides = [1, 1]} : vector<16x24xf32> to vector<16x8xf32>
    %124 = vector.broadcast %3 : vector<1x8xf32> to vector<16x8xf32>
    %125 = arith.mulf %121, %124 : vector<16x8xf32>
    %126 = vector.broadcast %4 : vector<1x8xf32> to vector<16x8xf32>
    %127 = arith.mulf %121, %126 : vector<16x8xf32>
    %128 = tpu.concatenate %125, %127 in 0 : vector<16x8xf32>, vector<16x8xf32> -> vector<32x8xf32>
    %cst_33 = arith.constant dense<0.000000e+00> : vector<32x16xf32>
    %129 = tpu.matmul %128, %122, %cst_33 {dimension_numbers = #tpu.dot_dimension_numbers<[1], [1], [0], [0], [0, 0, 1, 0], [], []>} : vector<32x8xf32>, vector<16x8xf32>, vector<32x16xf32> -> vector<32x16xf32>
    %130 = arith.addf %129, %7 : vector<32x16xf32>
    %cst_34 = arith.constant dense<0xFF800000> : vector<32xf32>
    %131 = vector.multi_reduction <maximumf>, %130, %cst_34 [1] : vector<32x16xf32> to vector<32xf32>
    %132 = vector.shape_cast %131 : vector<32xf32> to vector<32x1xf32>
    %133 = vector.broadcast %132 : vector<32x1xf32> to vector<32x16xf32>
    %134 = arith.subf %130, %133 : vector<32x16xf32>
    %135 = math.exp %134 : vector<32x16xf32>
    %cst_35 = arith.constant dense<0.000000e+00> : vector<32xf32>
    %136 = vector.multi_reduction <add>, %135, %cst_35 [1] : vector<32x16xf32> to vector<32xf32>
    %137 = vector.shape_cast %136 : vector<32xf32> to vector<32x1xf32>
    %138 = tpu.reciprocal %137 {approx = true} : vector<32x1xf32> -> vector<32x1xf32>
    %139 = vector.broadcast %138 : vector<32x1xf32> to vector<32x16xf32>
    %140 = arith.mulf %135, %139 : vector<32x16xf32>
    %cst_36 = arith.constant dense<0.000000e+00> : vector<32x8xf32>
    %141 = tpu.matmul %140, %123, %cst_36 {dimension_numbers = #tpu.dot_dimension_numbers<[1], [0], [0], [1], [0, 0, 1, 1], [], []>} : vector<32x16xf32>, vector<16x8xf32>, vector<32x8xf32> -> vector<32x8xf32>
    %142 = vector.extract_strided_slice %141 {offsets = [0, 0], sizes = [16, 8], strides = [1, 1]} : vector<32x8xf32> to vector<16x8xf32>
    %143 = vector.broadcast %5 : vector<1x8xf32> to vector<16x8xf32>
    %144 = arith.mulf %142, %143 : vector<16x8xf32>
    %145 = vector.extract_strided_slice %141 {offsets = [16, 0], sizes = [16, 8], strides = [1, 1]} : vector<32x8xf32> to vector<16x8xf32>
    %146 = vector.broadcast %6 : vector<1x8xf32> to vector<16x8xf32>
    %147 = arith.mulf %145, %146 : vector<16x8xf32>
    %148 = arith.addf %144, %147 : vector<16x8xf32>
    %cst_37 = arith.constant dense<0.000000e+00> : vector<16x8xf32>
    %149 = tpu.matmul %148, %106, %cst_37 {dimension_numbers = #tpu.dot_dimension_numbers<[1], [0], [0], [1], [0, 0, 1, 1], [], []>} : vector<16x8xf32>, vector<8x8xf32>, vector<16x8xf32> -> vector<16x8xf32>
    %150 = arith.addf %104, %149 : vector<16x8xf32>
    %151 = vector.broadcast %111 : vector<1x8xf32> to vector<16x8xf32>
    %152 = arith.addf %150, %151 : vector<16x8xf32>
    %cst_38 = arith.constant dense<0.000000e+00> : vector<16xf32>
    %153 = vector.multi_reduction <add>, %152, %cst_38 [1] : vector<16x8xf32> to vector<16xf32>
    %154 = vector.shape_cast %153 : vector<16xf32> to vector<16x1xf32>
    %cst_39 = arith.constant 1.250000e-01 : f32
    %155 = vector.broadcast %cst_39 : f32 to vector<16x1xf32>
    %156 = arith.mulf %154, %155 : vector<16x1xf32>
    %157 = vector.broadcast %156 : vector<16x1xf32> to vector<16x8xf32>
    %158 = arith.subf %152, %157 : vector<16x8xf32>
    %159 = arith.mulf %158, %158 : vector<16x8xf32>
    %cst_40 = arith.constant dense<0.000000e+00> : vector<16xf32>
    %160 = vector.multi_reduction <add>, %159, %cst_40 [1] : vector<16x8xf32> to vector<16xf32>
    %161 = vector.shape_cast %160 : vector<16xf32> to vector<16x1xf32>
    %cst_41 = arith.constant 0.142857149 : f32
    %162 = vector.broadcast %cst_41 : f32 to vector<16x1xf32>
    %163 = arith.mulf %161, %162 : vector<16x1xf32>
    %cst_42 = arith.constant 9.99999996E-13 : f32
    %164 = vector.broadcast %cst_42 : f32 to vector<16x1xf32>
    %165 = arith.addf %163, %164 : vector<16x1xf32>
    %166 = math.rsqrt %165 : vector<16x1xf32>
    %167 = vector.broadcast %166 : vector<16x1xf32> to vector<16x8xf32>
    %168 = arith.mulf %158, %167 : vector<16x8xf32>
    %169 = vector.broadcast %114 : vector<1x8xf32> to vector<16x8xf32>
    %170 = arith.mulf %168, %169 : vector<16x8xf32>
    %171 = vector.broadcast %115 : vector<1x8xf32> to vector<16x8xf32>
    %172 = arith.addf %170, %171 : vector<16x8xf32>
    %cst_43 = arith.constant dense<0.000000e+00> : vector<16x16xf32>
    %173 = tpu.matmul %172, %107, %cst_43 {dimension_numbers = #tpu.dot_dimension_numbers<[1], [0], [0], [1], [0, 0, 1, 1], [], []>} : vector<16x8xf32>, vector<8x16xf32>, vector<16x16xf32> -> vector<16x16xf32>
    %174 = vector.broadcast %112 : vector<1x16xf32> to vector<16x16xf32>
    %175 = arith.addf %173, %174 : vector<16x16xf32>
    %cst_44 = arith.constant 0.000000e+00 : f32
    %176 = vector.broadcast %cst_44 : f32 to vector<16x16xf32>
    %177 = arith.maximumf %175, %176 : vector<16x16xf32>
    %cst_45 = arith.constant dense<0.000000e+00> : vector<16x8xf32>
    %178 = tpu.matmul %177, %108, %cst_45 {dimension_numbers = #tpu.dot_dimension_numbers<[1], [0], [0], [1], [0, 0, 1, 1], [], []>} : vector<16x16xf32>, vector<16x8xf32>, vector<16x8xf32> -> vector<16x8xf32>
    %179 = vector.broadcast %113 : vector<1x8xf32> to vector<16x8xf32>
    %180 = arith.addf %178, %179 : vector<16x8xf32>
    %181 = arith.addf %172, %180 : vector<16x8xf32>
    %cst_46 = arith.constant dense<0.000000e+00> : vector<16xf32>
    %182 = vector.multi_reduction <add>, %181, %cst_46 [1] : vector<16x8xf32> to vector<16xf32>
    %183 = vector.shape_cast %182 : vector<16xf32> to vector<16x1xf32>
    %cst_47 = arith.constant 1.250000e-01 : f32
    %184 = vector.broadcast %cst_47 : f32 to vector<16x1xf32>
    %185 = arith.mulf %183, %184 : vector<16x1xf32>
    %186 = vector.broadcast %185 : vector<16x1xf32> to vector<16x8xf32>
    %187 = arith.subf %181, %186 : vector<16x8xf32>
    %188 = arith.mulf %187, %187 : vector<16x8xf32>
    %cst_48 = arith.constant dense<0.000000e+00> : vector<16xf32>
    %189 = vector.multi_reduction <add>, %188, %cst_48 [1] : vector<16x8xf32> to vector<16xf32>
    %190 = vector.shape_cast %189 : vector<16xf32> to vector<16x1xf32>
    %cst_49 = arith.constant 0.142857149 : f32
    %191 = vector.broadcast %cst_49 : f32 to vector<16x1xf32>
    %192 = arith.mulf %190, %191 : vector<16x1xf32>
    %cst_50 = arith.constant 9.99999996E-13 : f32
    %193 = vector.broadcast %cst_50 : f32 to vector<16x1xf32>
    %194 = arith.addf %192, %193 : vector<16x1xf32>
    %195 = math.rsqrt %194 : vector<16x1xf32>
    %196 = vector.broadcast %195 : vector<16x1xf32> to vector<16x8xf32>
    %197 = arith.mulf %187, %196 : vector<16x8xf32>
    %198 = vector.broadcast %116 : vector<1x8xf32> to vector<16x8xf32>
    %199 = arith.mulf %197, %198 : vector<16x8xf32>
    %200 = vector.broadcast %117 : vector<1x8xf32> to vector<16x8xf32>
    %201 = arith.addf %199, %200 : vector<16x8xf32>
    %c112 = arith.constant 112 : index
    %c0_51 = arith.constant 0 : index
    %202 = vector.load %arg1[%c112, %c0_51] : memref<152x128xf32, #tpu.memory_space<vmem>>, vector<8x16xf32>
    %cst_52 = arith.constant dense<0.000000e+00> : vector<8x8xf32>
    %203 = tpu.matmul %202, %201, %cst_52 {dimension_numbers = #tpu.dot_dimension_numbers<[1], [0], [0], [1], [0, 0, 1, 1], [], []>} : vector<8x16xf32>, vector<16x8xf32>, vector<8x8xf32> -> vector<8x8xf32>
    %c96 = arith.constant 96 : index
    %c0_53 = arith.constant 0 : index
    %204 = vector.load %arg1[%c96, %c0_53] : memref<152x128xf32, #tpu.memory_space<vmem>>, vector<8x128xf32>
    %cst_54 = arith.constant dense<0.000000e+00> : vector<8x128xf32>
    %205 = tpu.matmul %203, %204, %cst_54 {dimension_numbers = #tpu.dot_dimension_numbers<[1], [0], [0], [1], [0, 0, 1, 1], [], []>} : vector<8x8xf32>, vector<8x128xf32>, vector<8x128xf32> -> vector<8x128xf32>
    %206 = vector.broadcast %2 : vector<1x128xf32> to vector<8x128xf32>
    %207 = arith.addf %205, %206 : vector<8x128xf32>
    %c0_55 = arith.constant 0 : index
    %c0_56 = arith.constant 0 : index
    %208 = vector.load %arg2[%c0_55, %c0_56] : memref<8x128xf32, #tpu.memory_space<vmem>>, vector<8x128xf32>
    tpu.vector_store %arg2[%c0_55, %c0_56], %207 {strides = array<i32>} : memref<8x128xf32, #tpu.memory_space<vmem>>, vector<8x128xf32>,
    return
  }
}

</mosaic_0001>

<bundles_post_ra>
// kernel: tpu_custom_call.1
= control target key start
LH: loop header
LB: loop body
LE: loop exit
PB: predicated region body
PF: predicated region fallthrough
CT: control target
= control target key end

     0   :  { %7 = vsyncpa [#allocation3], 0  ;;  %s2224_s0 = inlined_call_operand.vmem [shape: f32[16,8], index: 0, kind: input, shape index: {}]   ;;  %s2225_s1 = inlined_call_operand.hbm [shape: f32[152,128], index: 1, kind: input, shape index: {}]   ;;  %s2226_s2 = inlined_call_operand.hbm [shape: f32[8,128], index: 2, kind: output, shape index: {}]  }
   0x1   :  { %8 = vsyncpa [#allocation4], 0  ;;  %s1952_s9 = smov [#allocation2]   ;;  %s1904_s13 = scalar_lea.hbm %s2225_s1, 2432 }
   0x2   :  { %s16_s10 = sshll.u32 %s1952_s9, 4  ;;  %p1905_p0 = scmp.ne.s32.totalorder %s2225_s1, %s1904_s13  ;;  %s17_s10 = int_to_ptr.vmem [resolvable:$true] %s16_s10 }
   0x3   :  { %p1908_p1 = scmp.lt.u32.totalorder %s1904_s13, %s2225_s1 }
   0x5   :  { %p1910_p2 = pnand %p1908_p1, %p1905_p0 }
   0x7   :  { %1913 = shalt.err (!%p1910_p2)
}
   0x8   :  { %s1914_s18 = scalar_lea.vmem %s17_s10, 2432  ;;  %p1919_p4 = scmp.lt.s32.totalorder %s17_s10, %s17_s10 }
   0x9   :  { %p1915_p3 = scmp.ne.s32.totalorder %s17_s10, %s1914_s18  ;;  %p1920_p5 = scmp.lt.s32.totalorder %s1914_s18, %s1914_s18 }
   0xb   :  { %p1921_p6 = por %p1920_p5, %p1919_p4 }
   0xd   :  { %p1922_p7 = pnand %p1921_p6, %p1915_p3 }
   0xf   :  { %1925 = shalt.err (!%p1922_p7)
}
  0x10   :  { %s1953_s19 = smov 128   ;;  %s1954_s20 = smov 8  }
  0x11   :  { %22 = dma.hbm_to_vmem [thread:$0]  %s2225_s1, 2432, %s17_s10, [#allocation3], %s1953_s19, %s1953_s19, %s1954_s20  }
  0x12   :  { %1948 = dma.done.wait [#allocation3], 2432  }
  0x13   :  { %1949 = vsyncadd [#allocation3], 4294964864  ;;  %vm43_vm0 = vcmask 64512   ;;  %v33_v0 = vld [vmem:[#allocation2] sm:$0xff]  ;;  %v1996_v2 = vld [vmem:[%s2224_s0 + $0x8] sm:$0xff]  ;;  %v39_v3 = vlaneseq  ;;  %vm244_vm2 = vcmask 130048  }
  0x14   :  { %v1991_v1 = vld [vmem:[%s2224_s0] sm:$0xff]  ;;  %1700 = vmatprep.subr.mxu0 %v33_v0  ;;  %v2007_v6 = vld [vmem:[#allocation2 + $0x28] sm:$0xff]  ;;  %s1955_s0 = smov 120   ;;  %vm2028_vm1 = vmpackc.low %vm43_vm0, %vm43_vm0  ;;  %s1956_s1 = smov 112   ;;  %vm1958_vm3 = vmmov 0  }
  0x15   :  { %1702 = vmatprep.mubr.msk.f32.mxu0 %vm43_vm0, %v1991_v1  ;;  %1701 = vmatpush3.msra.mxu0 %v33_v0  ;;  %v2002_v4 = vshrl.u32 %v39_v3, 7  ;;  %v2014_v9 = vld [vmem:[#allocation2 + $0x68] sm:$0xff]  ;;  %v2049_v27 = vld [vmem:[#allocation2 + $0x80] sm:$0xff]  ;;  %v2051_v28 = vld [vmem:[#allocation2 + $0x78] sm:$0xff]  ;;  %s1960_s27 = smov [#allocation5]  }
  0x16   :  { %1703 = vmatmul.mubr.msk.f32.vlgmr.msra.gmra.mrb[0].mxu0 %vm43_vm0, %v1996_v2  ;;  %v2056_v34 = vld [vmem:[#allocation2 + $0x88] sm:$0xff]  ;;  %v2059_v37 = vld [vmem:[#allocation2 + $0x90] sm:$0xff]  ;;  %s1598_s28 = sshll.u32 %s1960_s27, 4  ;;  %s1599_s28 = int_to_ptr.vmem [resolvable:$true] %s1598_s28 }
  0x17   :  { %v2005_v5 = vsub.s32 0, %v2002_v4  ;;  %v2010_v7 = vsub.s32 1, %v2002_v4  ;;  %v2033_v22 = vsub.s32 2, %v2002_v4  ;;  %s1926_s29 = scalar_lea.vmem %s1599_s28, 128  ;;  %p1931_p9 = scmp.lt.s32.totalorder %s1599_s28, %s1599_s28 }
  0x18   :  { %p1927_p8 = scmp.ne.s32.totalorder %s1599_s28, %s1926_s29  ;;  %p1932_p10 = scmp.lt.s32.totalorder %s1926_s29, %s1926_s29 }
  0x19   :  { %v42_v8 = vrot.slane %v2007_v6, %v2005_v5  ;;  %v2018_v11 = vrot.slane %v2014_v9, %v2010_v7  ;;  %v2041_v23 = vrot.slane %v2014_v9, %v2033_v22 }
  0x1a   :  { %p1933_p11 = por %p1932_p10, %p1931_p9 }
  0x1c   :  { %p1934_p12 = pnand %p1933_p11, %p1927_p8 }
  0xe9   :  { %v1704_v10 = vpop.f32.mrb[0].mxu0 }
  0xea   :  { %v122_v12 = vadd.f32 %v1704_v10, %v42_v8  ;;  %v116_v13 = vpop.f32.mrb[1].mxu0 }
  0xeb   :  { %v117_v14 = vadd.f32 %v116_v13, %v42_v8 }
  0xec   :  { %v130_v24 = vmul.f32 %v2018_v11, %v122_v12  ;;  %v136_v26 = vmul.f32 %v2041_v23, %v122_v12 }
  0xed   :  { %v2020_v15 = vpack.i.bf16 %v122_v12, %v117_v14  ;;  %v129_v16 = vmul.f32 %v2018_v11, %v117_v14  ;;  %v135_v25 = vmul.f32 %v2041_v23, %v117_v14 }
  0xef   :  { %1837 = vrot.lane.b32.xlu0 %v2020_v15, %s1955_s0  ;;  %1709 = vmatprep.mubr.msk.f32.mxu1 %vm43_vm0, %v129_v16 }
 0x161   :  { %v1838_v17 = vpop.permute.xlu0 %1837 }
 0x162   :  { %v1840_v18 = vunpack.i.h.bf16 %v1838_v17  ;;  %v1839_v19 = vunpack.i.l.bf16 %v1838_v17 }
 0x164   :  { %v1796_v21 = vpack.c.bf16 %v1840_v18, %v1839_v19 }
 0x166   :  { %1798 = vmatprep.subr.msk.bf16.mxu1 %vm2028_vm1, %v1796_v21 }
 0x167   :  { %1801 = vmatpush3.bf16.xpose.msk.msra.mxu1 %vm2028_vm1, %v1796_v21 }
 0x16e   :  { %1710 = vmatmul.mubr.msk.f32.vlgmr.msra.gmra.mrb[0].mxu1 %vm43_vm0, %v130_v24 }
 0x16f   :  { %1712 = vmatprep.mubr.msk.f32.mxu1 %vm43_vm0, %v135_v25 }
 0x172   :  { %1713 = vmatmul.mubr.msk.f32.gmra.mrb[2].mxu1 %vm43_vm0, %v136_v26  ;;  %v34_v26 = vld [vmem:[#allocation2 + $0x8] sm:$0xff] }
 0x241   :  { %v1711_v29 = vpop.f32.mrb[0].mxu1 }
 0x242   :  { %v231_v30 = vadd.f32 %v1711_v29, %v2049_v27  ;;  %v225_v31 = vpop.f32.mrb[1].mxu1  ;;  %v2076_v29 = vsub.s32 3, %v2002_v4 }
 0x243   :  { %v226_v32 = vadd.f32 %v225_v31, %v2051_v28 }
 0x244   :  { %v248_v33 = vsel %vm244_vm2, %v231_v30, -inf }
 0x245   :  { %249 = vmax.xlane.f32.xlu1 %v248_v33  ;;  %v1714_v35 = vpop.f32.mrb[2].mxu1  ;;  %v245_v36 = vsel %vm244_vm2, %v226_v32, -inf }
 0x246   :  { %v235_v38 = vpop.f32.mrb[3].mxu1  ;;  %246 = vmax.xlane.f32.xlu0 %v245_v36  ;;  %v241_v40 = vadd.f32 %v1714_v35, %v2059_v37 }
 0x247   :  { %v236_v39 = vadd.f32 %v235_v38, %v2056_v34 }
 0x248   :  { %v254_v42 = vsel %vm244_vm2, %v241_v40, -inf }
 0x249   :  { %v251_v41 = vsel %vm244_vm2, %v236_v39, -inf }
 0x24a   :  { %252 = vmax.xlane.f32.xlu1 %v251_v41 }
 0x24e   :  { %255 = vmax.xlane.f32.xlu1 %v254_v42 }
 0x2d2   :  { %v250_v43 = vpop.xlane.xlu1 %249 }
 0x2d3   :  { %v258_v44 = vsub.f32 %v231_v30, %v250_v43  ;;  %v247_v45 = vpop.xlane.xlu0 %246  ;;  %v2079_v30 = vsub.s32 4, %v2002_v4 }
 0x2d4   :  { %v257_v46 = vsub.f32 %v226_v32, %v247_v45  ;;  %v2083_v32 = vrot.slane %v2014_v9, %v2076_v29 }
 0x2d5   :  { %v263_v47 = vmul.f32 1.442695, %v258_v44  ;;  %v2087_v35 = vrot.slane %v2014_v9, %v2079_v30 }
 0x2d6   :  { %v261_v48 = vmul.f32 1.442695, %v257_v46  ;;  %v492_v46 = vrot.slane %v2007_v6, %v2010_v7 }
 0x2d7   :  { %1856 = vpow2.f32 %v263_v47  ;;  %v253_v49 = vpop.xlane.xlu1 %252 }
 0x2d8   :  { %1858 = vpow2.f32 %v261_v48  ;;  %v259_v50 = vsub.f32 %v236_v39, %v253_v49 }
 0x2da   :  { %v265_v53 = vmul.f32 1.442695, %v259_v50 }
 0x2db   :  { %v256_v51 = vpop.xlane.xlu1 %255 }
 0x2dc   :  { %v260_v52 = vsub.f32 %v241_v40, %v256_v51 }
 0x2de   :  { %v267_v54 = vmul.f32 1.442695, %v260_v52 }
 0x2e0   :  { %1860 = vpow2.f32 %v267_v54 }
 0x2e1   :  { %v1857_v55 = vpop.eup %1856  ;;  %1862 = vpow2.f32 %v265_v53 }
 0x2e2   :  { %v272_v56 = vsel %vm244_vm2, %v1857_v55, 0.0  ;;  %v1859_v57 = vpop.eup %1858 }
 0x2e3   :  { %273 = vadd.xlane.f32.xlu1 %v272_v56  ;;  %v269_v58 = vsel %vm244_vm2, %v1859_v57, 0.0 }
 0x2e7   :  { %270 = vadd.xlane.f32.xlu1 %v269_v58 }
 0x2ea   :  { %v1861_v59 = vpop.eup %1860 }
 0x2eb   :  { %v278_v60 = vsel %vm244_vm2, %v1861_v59, 0.0  ;;  %v1863_v61 = vpop.eup %1862 }
 0x2ec   :  { %279 = vadd.xlane.f32.xlu1 %v278_v60  ;;  %v275_v62 = vsel %vm244_vm2, %v1863_v61, 0.0 }
 0x2f0   :  { %276 = vadd.xlane.f32.xlu1 %v275_v62  ;;  %v35_v62 = vld [vmem:[#allocation2 + $0x10] sm:$0xff] }
 0x2f1   :  { %1730 = vmatprep.subr.mxu1 %v35_v62 }
 0x2f2   :  { %1731 = vmatpush3.msra.mxu1 %v35_v62  ;;  %v745_v62 = vld [vmem:[#allocation2 + $0x30] sm:$0xff] }
 0x2f3   :  { %1742 = vmatprep.subr.mxu1 %v745_v62 }
 0x301   :  { %1842 = vrot.lane.b32.xlu1 %v2020_v15, %s1956_s1 }
 0x370   :  { %v274_v63 = vpop.xlane.xlu1 %273 }
 0x374   :  { %v271_v0 = vpop.xlane.xlu1 %270 }
 0x375   :  { %1864 = vrcp.f32 %v271_v0 }
 0x376   :  { %1866 = vrcp.f32 %v274_v63 }
 0x379   :  { %v280_v3 = vpop.xlane.xlu1 %279 }
 0x37d   :  { %v277_v8 = vpop.xlane.xlu1 %276 }
 0x37e   :  { %1868 = vrcp.f32 %v277_v8 }
 0x37f   :  { %v1865_v10 = vpop.eup %1864  ;;  %1870 = vrcp.f32 %v280_v3 }
 0x380   :  { %v285_v12 = vmul.f32 %v1865_v10, %v1859_v57  ;;  %v1867_v18 = vpop.eup %1866 }
 0x381   :  { %v1843_v13 = vpop.permute.xlu1 %1842  ;;  %v286_v19 = vmul.f32 %v1867_v18, %v1857_v55 }
 0x382   :  { %v1845_v14 = vunpack.i.h.bf16 %v1843_v13  ;;  %v1844_v16 = vunpack.i.l.bf16 %v1843_v13  ;;  %1719 = vmatprep.mubr.msk.f32.mxu0 %vm244_vm2, %v285_v12  ;;  %v529_v13 = vsub.s32 5, %v2002_v4 }
 0x384   :  { %v1802_v17 = vpack.c.bf16 %v1845_v14, %v1844_v16  ;;  %v524_v14 = vrot.slane %v2007_v6, %v2079_v30  ;;  %v530_v18 = vrot.slane %v2007_v6, %v529_v13 }
 0x386   :  { %1803 = vmatprep.subr.bf16.mxu0 %v1802_v17 }
 0x387   :  { %1805 = vmatpush3.bf16.msra.mxu0 %v1802_v17 }
 0x388   :  { %v1869_v15 = vpop.eup %1868  ;;  %1725 = vmatprep.subr.mxu0 %v34_v26 }
 0x389   :  { %v1871_v21 = vpop.eup %1870  ;;  %v287_v24 = vmul.f32 %v1869_v15, %v1863_v61 }
 0x38a   :  { %1720 = vmatmul.mubr.msk.f32.vlgmr.msra.gmra.mrb[2].mxu0 %vm244_vm2, %v286_v19  ;;  %v288_v25 = vmul.f32 %v1871_v21, %v1861_v59 }
 0x38b   :  { %1722 = vmatprep.mubr.msk.f32.mxu0 %vm244_vm2, %v287_v24  ;;  %1726 = vmatpush3.msra.mxu0 %v34_v26 }
 0x38e   :  { %1723 = vmatmul.mubr.msk.f32.gmra.mrb[4].mxu0 %vm244_vm2, %v288_v25 }
 0x45d   :  { %v1721_v31 = vpop.f32.mrb[2].mxu0 }
 0x45e   :  { %v373_v33 = vpop.f32.mrb[3].mxu0  ;;  %v397_v38 = vmul.f32 %v1721_v31, %v2083_v32  ;;  %v36_v31 = vld [vmem:[#allocation2 + $0x18] sm:$0xff] }
 0x45f   :  { %v396_v41 = vmul.f32 %v2083_v32, %v373_v33  ;;  %v37_v33 = vld [vmem:[#allocation2 + $0x20] sm:$0xff] }
 0x461   :  { %v1724_v36 = vpop.f32.mrb[4].mxu0 }
 0x462   :  { %v403_v39 = vmul.f32 %v1724_v36, %v2087_v35  ;;  %v383_v40 = vpop.f32.mrb[5].mxu0  ;;  %v1806_v36 = vpack.c.bf16 %v37_v33, %v36_v31 }
 0x463   :  { %v402_v42 = vmul.f32 %v2087_v35, %v383_v40 }
 0x464   :  { %v405_v43 = vadd.f32 %v403_v39, %v397_v38  ;;  %1807 = vmatprep.subr.bf16.mxu0 %v1806_v36  ;;  %v536_v38 = vrot.slane %v2007_v6, %v2033_v22 }
 0x465   :  { %v404_v44 = vadd.f32 %v402_v42, %v396_v41 }
 0x467   :  { %1727 = vmatprep.mubr.msk.f32.mxu0 %vm43_vm0, %v404_v44 }
 0x468   :  { %1728 = vmatmul.mubr.msk.f32.vlgmr.msra.gmra.mrb[6].mxu0 %vm43_vm0, %v405_v43 }
 0x469   :  { %1809 = vmatpush3.bf16.msra.mxu0 %v1806_v36  ;;  %v2137_v36 = vld [vmem:[#allocation2 + $0x58] sm:$0xff] }
 0x53b   :  { %v1729_v45 = vpop.f32.mrb[6].mxu0 }
 0x53c   :  { %v478_v47 = vpop.f32.mrb[7].mxu0  ;;  %v488_v48 = vadd.f32 %v1729_v45, %v1996_v2  ;;  %v623_v45 = vrot.slane %v2007_v6, %v2076_v29 }
 0x53d   :  { %v487_v49 = vadd.f32 %v478_v47, %v1991_v1 }
 0x53e   :  { %v494_v52 = vadd.f32 %v492_v46, %v488_v48 }
 0x53f   :  { %v493_v50 = vadd.f32 %v492_v46, %v487_v49 }
 0x540   :  { %v498_v53 = vsel %vm43_vm0, %v494_v52, 0.0 }
 0x541   :  { %v495_v51 = vsel %vm43_vm0, %v493_v50, 0.0 }
 0x542   :  { %496 = vadd.xlane.f32.xlu0 %v495_v51 }
 0x546   :  { %499 = vadd.xlane.f32.xlu0 %v498_v53 }
 0x5cf   :  { %v497_v54 = vpop.xlane.xlu0 %496 }
 0x5d0   :  { %v501_v55 = vmul.f32 0.125, %v497_v54 }
 0x5d2   :  { %v503_v56 = vsub.f32 %v493_v50, %v501_v55 }
 0x5d3   :  { %v500_v57 = vpop.xlane.xlu0 %499 }
 0x5d4   :  { %v502_v58 = vmul.f32 0.125, %v500_v57  ;;  %v505_v59 = vmul.f32 %v503_v56, %v503_v56 }
 0x5d6   :  { %v504_v60 = vsub.f32 %v494_v52, %v502_v58  ;;  %v507_v61 = vsel %vm43_vm0, %v505_v59, 0.0 }
 0x5d7   :  { %508 = vadd.xlane.f32.xlu0 %v507_v61 }
 0x5d8   :  { %v506_v2 = vmul.f32 %v504_v60, %v504_v60 }
 0x5da   :  { %v510_v1 = vsel %vm43_vm0, %v506_v2, 0.0 }
 0x5db   :  { %511 = vadd.xlane.f32.xlu1 %v510_v1 }
 0x664   :  { %v509_v63 = vpop.xlane.xlu0 %508 }
 0x665   :  { %v513_v0 = vmul.f32 0.14285715, %v509_v63 }
 0x667   :  { %v515_v3 = vadd.f32 1e-12, %v513_v0 }
 0x668   :  { %v512_v8 = vpop.xlane.xlu1 %511 }
 0x669   :  { %1872 = vrsqrt.f32 %v515_v3  ;;  %v514_v10 = vmul.f32 0.14285715, %v512_v8 }
 0x66b   :  { %v516_v12 = vadd.f32 1e-12, %v514_v10 }
 0x66d   :  { %1874 = vrsqrt.f32 %v516_v12 }
 0x673   :  { %v1873_v16 = vpop.eup %1872 }
 0x674   :  { %v519_v17 = vmul.f32 %v1873_v16, %v503_v56  ;;  %v741_v16 = vsub.s32 7, %v2002_v4 }
 0x676   :  { %v525_v15 = vmul.f32 %v524_v14, %v519_v17 }
 0x677   :  { %v1875_v19 = vpop.eup %1874 }
 0x678   :  { %v520_v21 = vmul.f32 %v1875_v19, %v504_v60  ;;  %v531_v24 = vadd.f32 %v530_v18, %v525_v15  ;;  %v742_v19 = vrot.slane %v2007_v6, %v741_v16 }
 0x67a   :  { %v526_v25 = vmul.f32 %v524_v14, %v520_v21  ;;  %1732 = vmatprep.mubr.msk.f32.mxu1 %vm43_vm0, %v531_v24  ;;  %v735_v14 = vsub.s32 6, %v2002_v4 }
 0x67c   :  { %v532_v26 = vadd.f32 %v530_v18, %v526_v25  ;;  %v736_v17 = vrot.slane %v2007_v6, %v735_v14 }
 0x67e   :  { %1733 = vmatmul.mubr.msk.f32.vlgmr.msra.gmra.mrb[4].mxu1 %vm43_vm0, %v532_v26 }
 0x67f   :  { %1743 = vmatpush3.msra.mxu1 %v745_v62 }
 0x751   :  { %v1734_v39 = vpop.f32.mrb[4].mxu1 }
 0x752   :  { %v615_v40 = vadd.f32 %v1734_v39, %v536_v38  ;;  %v609_v41 = vpop.f32.mrb[5].mxu1 }
 0x753   :  { %v610_v42 = vadd.f32 %v609_v41, %v536_v38  ;;  %v754_v38 = vrot.slane %v2137_v36, %v2005_v5 }
 0x754   :  { %v619_v44 = vmax.f32 %v615_v40, 0.0 }
 0x755   :  { %v618_v43 = vmax.f32 %v610_v42, 0.0 }
 0x757   :  { %1739 = vmatprep.mubr.msk.f32.mxu0 %vm244_vm2, %v618_v43 }
 0x758   :  { %1740 = vmatmul.mubr.msk.f32.vlgmr.msra.gmra.mrb[8].mxu0 %vm244_vm2, %v619_v44 }
 0x82b   :  { %v1741_v46 = vpop.f32.mrb[8].mxu0 }
 0x82c   :  { %v696_v47 = vpop.f32.mrb[9].mxu0  ;;  %v702_v48 = vadd.f32 %v1741_v46, %v623_v45 }
 0x82d   :  { %v697_v49 = vadd.f32 %v696_v47, %v623_v45 }
 0x82e   :  { %v706_v52 = vadd.f32 %v702_v48, %v532_v26 }
 0x82f   :  { %v705_v50 = vadd.f32 %v697_v49, %v531_v24 }
 0x830   :  { %v710_v53 = vsel %vm43_vm0, %v706_v52, 0.0 }
 0x831   :  { %v707_v51 = vsel %vm43_vm0, %v705_v50, 0.0 }
 0x832   :  { %708 = vadd.xlane.f32.xlu0 %v707_v51 }
 0x836   :  { %711 = vadd.xlane.f32.xlu0 %v710_v53 }
 0x8bf   :  { %v709_v54 = vpop.xlane.xlu0 %708 }
 0x8c0   :  { %v713_v55 = vmul.f32 0.125, %v709_v54 }
 0x8c2   :  { %v715_v56 = vsub.f32 %v705_v50, %v713_v55 }
 0x8c3   :  { %v712_v57 = vpop.xlane.xlu0 %711 }
 0x8c4   :  { %v714_v58 = vmul.f32 0.125, %v712_v57  ;;  %v717_v59 = vmul.f32 %v715_v56, %v715_v56 }
 0x8c6   :  { %v716_v60 = vsub.f32 %v706_v52, %v714_v58  ;;  %v719_v61 = vsel %vm43_vm0, %v717_v59, 0.0 }
 0x8c7   :  { %720 = vadd.xlane.f32.xlu0 %v719_v61 }
 0x8c8   :  { %v718_v2 = vmul.f32 %v716_v60, %v716_v60 }
 0x8ca   :  { %v722_v1 = vsel %vm43_vm0, %v718_v2, 0.0 }
 0x8cb   :  { %723 = vadd.xlane.f32.xlu0 %v722_v1 }
 0x954   :  { %v721_v63 = vpop.xlane.xlu0 %720 }
 0x955   :  { %v725_v0 = vmul.f32 0.14285715, %v721_v63 }
 0x957   :  { %v727_v3 = vadd.f32 1e-12, %v725_v0 }
 0x958   :  { %v724_v8 = vpop.xlane.xlu0 %723 }
 0x959   :  { %1876 = vrsqrt.f32 %v727_v3  ;;  %v726_v10 = vmul.f32 0.14285715, %v724_v8 }
 0x95b   :  { %v728_v12 = vadd.f32 1e-12, %v726_v10 }
 0x95d   :  { %1878 = vrsqrt.f32 %v728_v12 }
 0x963   :  { %v1877_v18 = vpop.eup %1876 }
 0x964   :  { %v731_v15 = vmul.f32 %v1877_v18, %v715_v56 }
 0x966   :  { %v737_v21 = vmul.f32 %v736_v17, %v731_v15 }
 0x967   :  { %v1879_v24 = vpop.eup %1878 }
 0x968   :  { %v732_v25 = vmul.f32 %v1879_v24, %v716_v60  ;;  %v2129_v26 = vadd.f32 %v742_v19, %v737_v21 }
 0x96a   :  { %v738_v31 = vmul.f32 %v736_v17, %v732_v25  ;;  %1744 = vmatprep.mubr.msk.f32.mxu1 %vm43_vm0, %v2129_v26 }
 0x96c   :  { %v2133_v33 = vadd.f32 %v742_v19, %v738_v31 }
 0x96e   :  { %1745 = vmatmul.mubr.msk.f32.vlgmr.msra.gmra.mrb[6].mxu1 %vm43_vm0, %v2133_v33 }
 0xa41   :  { %v1746_v6 = vpop.f32.mrb[6].mxu1 }
 0xa42   :  { %v833_v39 = vadd.f32 %v1746_v6, %v754_v38  ;;  %v827_v40 = vpop.f32.mrb[7].mxu1 }
 0xa43   :  { %v828_v41 = vadd.f32 %v827_v40, %v754_v38 }
 0xa44   :  { %v837_v48 = vmul.f32 %v833_v39, %v2018_v11  ;;  %v839_v50 = vmul.f32 %v833_v39, %v2041_v23 }
 0xa45   :  { %v1846_v42 = vpack.i.bf16 %v833_v39, %v828_v41  ;;  %v836_v43 = vmul.f32 %v828_v41, %v2018_v11  ;;  %v838_v49 = vmul.f32 %v828_v41, %v2041_v23 }
 0xa47   :  { %1847 = vrot.lane.b32.xlu0 %v1846_v42, %s1955_s0  ;;  %1751 = vmatprep.mubr.msk.f32.mxu0 %vm43_vm0, %v836_v43 }
 0xab9   :  { %v1848_v44 = vpop.permute.xlu0 %1847 }
 0xaba   :  { %v1850_v45 = vunpack.i.h.bf16 %v1848_v44  ;;  %v1849_v46 = vunpack.i.l.bf16 %v1848_v44 }
 0xabc   :  { %v1810_v47 = vpack.c.bf16 %v1850_v45, %v1849_v46 }
 0xabe   :  { %1812 = vmatprep.subr.msk.bf16.mxu0 %vm2028_vm1, %v1810_v47 }
 0xabf   :  { %1815 = vmatpush3.bf16.xpose.msk.msra.mxu0 %vm2028_vm1, %v1810_v47 }
 0xac6   :  { %1752 = vmatmul.mubr.msk.f32.vlgmr.msra.gmra.mrb[10].mxu0 %vm43_vm0, %v837_v48 }
 0xac7   :  { %1754 = vmatprep.mubr.msk.f32.mxu0 %vm43_vm0, %v838_v49 }
 0xaca   :  { %1755 = vmatmul.mubr.msk.f32.gmra.mrb[12].mxu0 %vm43_vm0, %v839_v50  ;;  %v746_v50 = vld [vmem:[#allocation2 + $0x38] sm:$0xff] }
 0xb99   :  { %v1753_v51 = vpop.f32.mrb[10].mxu0 }
 0xb9a   :  { %v934_v52 = vadd.f32 %v1753_v51, %v2049_v27  ;;  %v928_v53 = vpop.f32.mrb[11].mxu0 }
 0xb9b   :  { %v929_v54 = vadd.f32 %v928_v53, %v2051_v28 }
 0xb9c   :  { %v950_v20 = vsel %vm244_vm2, %v934_v52, -inf }
 0xb9d   :  { %951 = vmax.xlane.f32.xlu0 %v950_v20  ;;  %v1756_v11 = vpop.f32.mrb[12].mxu0  ;;  %v947_v55 = vsel %vm244_vm2, %v929_v54, -inf }
 0xb9e   :  { %v938_v56 = vpop.f32.mrb[13].mxu0  ;;  %948 = vmax.xlane.f32.xlu1 %v947_v55  ;;  %v944_v23 = vadd.f32 %v1756_v11, %v2059_v37 }
 0xb9f   :  { %v939_v57 = vadd.f32 %v938_v56, %v2056_v34 }
 0xba0   :  { %v956_v27 = vsel %vm244_vm2, %v944_v23, -inf }
 0xba1   :  { %v953_v58 = vsel %vm244_vm2, %v939_v57, -inf }
 0xba2   :  { %954 = vmax.xlane.f32.xlu1 %v953_v58 }
 0xba6   :  { %957 = vmax.xlane.f32.xlu1 %v956_v27  ;;  %v1186_v27 = vrot.slane %v2137_v36, %v2010_v7 }
 0xc2a   :  { %v952_v59 = vpop.xlane.xlu0 %951 }
 0xc2b   :  { %v960_v28 = vsub.f32 %v934_v52, %v952_v59  ;;  %v949_v60 = vpop.xlane.xlu1 %948 }
 0xc2c   :  { %v959_v61 = vsub.f32 %v929_v54, %v949_v60 }
 0xc2d   :  { %v965_v2 = vmul.f32 1.442695, %v960_v28 }
 0xc2e   :  { %v963_v1 = vmul.f32 1.442695, %v959_v61 }
 0xc2f   :  { %1880 = vpow2.f32 %v965_v2  ;;  %v955_v62 = vpop.xlane.xlu1 %954 }
 0xc30   :  { %1882 = vpow2.f32 %v963_v1  ;;  %v961_v63 = vsub.f32 %v939_v57, %v955_v62 }
 0xc32   :  { %v967_v3 = vmul.f32 1.442695, %v961_v63 }
 0xc33   :  { %v958_v0 = vpop.xlane.xlu1 %957 }
 0xc34   :  { %v962_v34 = vsub.f32 %v944_v23, %v958_v0 }
 0xc36   :  { %v969_v37 = vmul.f32 1.442695, %v962_v34 }
 0xc38   :  { %1884 = vpow2.f32 %v969_v37 }
 0xc39   :  { %v1881_v8 = vpop.eup %1880  ;;  %1886 = vpow2.f32 %v967_v3 }
 0xc3a   :  { %v974_v10 = vsel %vm244_vm2, %v1881_v8, 0.0  ;;  %v1883_v12 = vpop.eup %1882 }
 0xc3b   :  { %975 = vadd.xlane.f32.xlu1 %v974_v10  ;;  %v971_v17 = vsel %vm244_vm2, %v1883_v12, 0.0 }
 0xc3f   :  { %972 = vadd.xlane.f32.xlu1 %v971_v17 }
 0xc42   :  { %v1885_v18 = vpop.eup %1884 }
 0xc43   :  { %v980_v15 = vsel %vm244_vm2, %v1885_v18, 0.0  ;;  %v1887_v19 = vpop.eup %1886 }
 0xc44   :  { %981 = vadd.xlane.f32.xlu1 %v980_v15  ;;  %v977_v21 = vsel %vm244_vm2, %v1887_v19, 0.0 }
 0xc48   :  { %978 = vadd.xlane.f32.xlu1 %v977_v21  ;;  %v1218_v21 = vrot.slane %v2137_v36, %v2079_v30  ;;  %v1230_v30 = vrot.slane %v2137_v36, %v2033_v22 }
 0xc59   :  { %1852 = vrot.lane.b32.xlu1 %v1846_v42, %s1956_s1 }
 0xcc8   :  { %v976_v24 = vpop.xlane.xlu1 %975 }
 0xccc   :  { %v973_v25 = vpop.xlane.xlu1 %972 }
 0xccd   :  { %1888 = vrcp.f32 %v973_v25 }
 0xcce   :  { %1890 = vrcp.f32 %v976_v24 }
 0xcd1   :  { %v982_v31 = vpop.xlane.xlu1 %981 }
 0xcd5   :  { %v979_v38 = vpop.xlane.xlu1 %978 }
 0xcd6   :  { %1892 = vrcp.f32 %v979_v38 }
 0xcd7   :  { %v1889_v6 = vpop.eup %1888  ;;  %1894 = vrcp.f32 %v982_v31  ;;  %v1224_v31 = vrot.slane %v2137_v36, %v529_v13 }
 0xcd8   :  { %v987_v39 = vmul.f32 %v1889_v6, %v1883_v12  ;;  %v1891_v45 = vpop.eup %1890 }
 0xcd9   :  { %v1853_v40 = vpop.permute.xlu1 %1852  ;;  %v988_v46 = vmul.f32 %v1891_v45, %v1881_v8  ;;  %v747_v8 = vld [vmem:[#allocation2 + $0x40] sm:$0xff]  ;;  %v749_v45 = vld [vmem:[#allocation2 + $0x50] sm:$0xff] }
 0xcda   :  { %v1855_v41 = vunpack.i.h.bf16 %v1853_v40  ;;  %v1854_v43 = vunpack.i.l.bf16 %v1853_v40  ;;  %1761 = vmatprep.mubr.msk.f32.mxu1 %vm244_vm2, %v987_v39  ;;  %1772 = vmatprep.subr.mxu0 %v747_v8 }
 0xcdb   :  { %1773 = vmatpush3.msra.mxu0 %v747_v8 }
 0xcdc   :  { %v1816_v44 = vpack.c.bf16 %v1855_v41, %v1854_v43 }
 0xcde   :  { %1817 = vmatprep.subr.bf16.mxu1 %v1816_v44 }
 0xcdf   :  { %1819 = vmatpush3.bf16.msra.mxu1 %v1816_v44  ;;  %v748_v44 = vld [vmem:[#allocation2 + $0x48] sm:$0xff] }
 0xce0   :  { %v1893_v42 = vpop.eup %1892  ;;  %1767 = vmatprep.subr.mxu1 %v746_v50 }
 0xce1   :  { %v1895_v47 = vpop.eup %1894  ;;  %v989_v48 = vmul.f32 %v1893_v42, %v1887_v19  ;;  %v1820_v42 = vpack.c.bf16 %v749_v45, %v748_v44 }
 0xce2   :  { %1762 = vmatmul.mubr.msk.f32.vlgmr.msra.gmra.mrb[8].mxu1 %vm244_vm2, %v988_v46  ;;  %v990_v49 = vmul.f32 %v1895_v47, %v1885_v18 }
 0xce3   :  { %1764 = vmatprep.mubr.msk.f32.mxu1 %vm244_vm2, %v989_v48  ;;  %1768 = vmatpush3.msra.mxu1 %v746_v50 }
 0xce4   :  { %1821 = vmatprep.subr.bf16.mxu1 %v1820_v42 }
 0xce6   :  { %1765 = vmatmul.mubr.msk.f32.gmra.mrb[10].mxu1 %vm244_vm2, %v990_v49 }
 0xdb5   :  { %v1763_v51 = vpop.f32.mrb[8].mxu1 }
 0xdb6   :  { %v1075_v52 = vpop.f32.mrb[9].mxu1  ;;  %v1095_v54 = vmul.f32 %v1763_v51, %v2083_v32  ;;  %v1317_v51 = vrot.slane %v2137_v36, %v2076_v29 }
 0xdb7   :  { %v1094_v55 = vmul.f32 %v1075_v52, %v2083_v32 }
 0xdb9   :  { %v1766_v53 = vpop.f32.mrb[10].mxu1 }
 0xdba   :  { %v1097_v20 = vmul.f32 %v1766_v53, %v2087_v35  ;;  %v1085_v11 = vpop.f32.mrb[11].mxu1 }
 0xdbb   :  { %v1096_v56 = vmul.f32 %v1085_v11, %v2087_v35 }
 0xdbc   :  { %v1099_v57 = vadd.f32 %v1097_v20, %v1095_v54 }
 0xdbd   :  { %v1098_v23 = vadd.f32 %v1096_v56, %v1094_v55 }
 0xdbf   :  { %1769 = vmatprep.mubr.msk.f32.mxu1 %vm43_vm0, %v1098_v23 }
 0xdc0   :  { %1770 = vmatmul.mubr.msk.f32.vlgmr.msra.gmra.mrb[12].mxu1 %vm43_vm0, %v1099_v57 }
 0xdc1   :  { %1823 = vmatpush3.bf16.msra.mxu1 %v1820_v42 }
 0xe93   :  { %v1771_v58 = vpop.f32.mrb[12].mxu1 }
 0xe94   :  { %v1172_v59 = vpop.f32.mrb[13].mxu1  ;;  %v1182_v28 = vadd.f32 %v1771_v58, %v2133_v33 }
 0xe95   :  { %v1181_v60 = vadd.f32 %v1172_v59, %v2129_v26 }
 0xe96   :  { %v1188_v2 = vadd.f32 %v1186_v27, %v1182_v28 }
 0xe97   :  { %v1187_v61 = vadd.f32 %v1186_v27, %v1181_v60 }
 0xe98   :  { %v1192_v35 = vsel %vm43_vm0, %v1188_v2, 0.0 }
 0xe99   :  { %v1189_v32 = vsel %vm43_vm0, %v1187_v61, 0.0 }
 0xe9a   :  { %1190 = vadd.xlane.f32.xlu0 %v1189_v32 }
 0xe9e   :  { %1193 = vadd.xlane.f32.xlu0 %v1192_v35  ;;  %v1959_v35 = vmov 0.0  }
 0xe9f   :  { %1791 = vmatprep.subr.mxu1 %v1959_v35 }
 0xf27   :  { %v1191_v1 = vpop.xlane.xlu0 %1190 }
 0xf28   :  { %v1195_v62 = vmul.f32 0.125, %v1191_v1  ;;  %v1513_v1 = vld [vmem:[#allocation2 + $0x60] sm:$0xff] }
 0xf2a   :  { %v1197_v63 = vsub.f32 %v1187_v61, %v1195_v62 }
 0xf2b   :  { %v1194_v0 = vpop.xlane.xlu0 %1193 }
 0xf2c   :  { %v1196_v34 = vmul.f32 0.125, %v1194_v0  ;;  %v1199_v3 = vmul.f32 %v1197_v63, %v1197_v63 }
 0xf2e   :  { %v1198_v7 = vsub.f32 %v1188_v2, %v1196_v34  ;;  %v1201_v37 = vsel %vm43_vm0, %v1199_v3, 0.0  ;;  %v1957_v2 = vmov 0.0|0.0  }
 0xf2f   :  { %1202 = vadd.xlane.f32.xlu0 %v1201_v37  ;;  %1824 = vmatprep.subr.bf16.mxu0 %v1957_v2 }
 0xf30   :  { %v1200_v33 = vmul.f32 %v1198_v7, %v1198_v7 }
 0xf32   :  { %v1204_v26 = vsel %vm43_vm0, %v1200_v33, 0.0 }
 0xf33   :  { %1205 = vadd.xlane.f32.xlu1 %v1204_v26  ;;  %v1430_v26 = vrot.slane %v2137_v36, %v735_v14  ;;  %v1517_v14 = vrot.slane %v2014_v9, %v2005_v5 }
 0xfbc   :  { %v1203_v10 = vpop.xlane.xlu0 %1202 }
 0xfbd   :  { %v1207_v12 = vmul.f32 0.14285715, %v1203_v10 }
 0xfbf   :  { %v1209_v17 = vadd.f32 1e-12, %v1207_v12 }
 0xfc0   :  { %v1206_v18 = vpop.xlane.xlu1 %1205 }
 0xfc1   :  { %1896 = vrsqrt.f32 %v1209_v17  ;;  %v1208_v15 = vmul.f32 0.14285715, %v1206_v18  ;;  %v1436_v17 = vrot.slane %v2137_v36, %v741_v16 }
 0xfc3   :  { %v1210_v19 = vadd.f32 1e-12, %v1208_v15 }
 0xfc5   :  { %1898 = vrsqrt.f32 %v1210_v19 }
 0xfcb   :  { %v1897_v24 = vpop.eup %1896 }
 0xfcc   :  { %v1213_v25 = vmul.f32 %v1897_v24, %v1197_v63  ;;  %v1439_v24 = vld [vmem:[#allocation2 + $0x70] sm:$0xff] }
 0xfce   :  { %v1219_v38 = vmul.f32 %v1218_v21, %v1213_v25 }
 0xfcf   :  { %v1899_v6 = vpop.eup %1898 }
 0xfd0   :  { %v1214_v39 = vmul.f32 %v1899_v6, %v1198_v7  ;;  %v1225_v40 = vadd.f32 %v1224_v31, %v1219_v38 }
 0xfd2   :  { %v1220_v41 = vmul.f32 %v1218_v21, %v1214_v39  ;;  %1774 = vmatprep.mubr.msk.f32.mxu0 %vm43_vm0, %v1225_v40 }
 0xfd4   :  { %v1226_v43 = vadd.f32 %v1224_v31, %v1220_v41 }
 0xfd6   :  { %1775 = vmatmul.mubr.msk.f32.vlgmr.msra.gmra.mrb[14].mxu0 %vm43_vm0, %v1226_v43 }
 0xfd7   :  { %1788 = vmatprep.mubr.msk.f32.mxu0 %vm1958_vm3, %v1959_v35 }
0x10a9   :  { %v1776_v46 = vpop.f32.mrb[14].mxu0 }
0x10aa   :  { %v1309_v13 = vadd.f32 %v1776_v46, %v1230_v30  ;;  %v1303_v47 = vpop.f32.mrb[15].mxu0 }
0x10ab   :  { %v1304_v48 = vadd.f32 %v1303_v47, %v1230_v30 }
0x10ac   :  { %v1313_v50 = vmax.f32 %v1309_v13, 0.0 }
0x10ad   :  { %v1312_v49 = vmax.f32 %v1304_v48, 0.0 }
0x10af   :  { %1781 = vmatprep.mubr.msk.f32.mxu1 %vm244_vm2, %v1312_v49 }
0x10b0   :  { %1782 = vmatmul.mubr.msk.f32.vlgmr.msra.gmra.mrb[14].mxu1 %vm244_vm2, %v1313_v50 }
0x10b1   :  { %1793 = vmatprep.mubr.msk.f32.mxu1 %vm1958_vm3, %v1959_v35  ;;  %1792 = vmatpush3.msra.mxu1 %v1513_v1 }
0x1183   :  { %v1783_v52 = vpop.f32.mrb[14].mxu1 }
0x1184   :  { %v1390_v53 = vpop.f32.mrb[15].mxu1  ;;  %v1396_v54 = vadd.f32 %v1783_v52, %v1317_v51 }
0x1185   :  { %v1391_v20 = vadd.f32 %v1390_v53, %v1317_v51 }
0x1186   :  { %v1400_v55 = vadd.f32 %v1396_v54, %v1226_v43 }
0x1187   :  { %v1399_v11 = vadd.f32 %v1391_v20, %v1225_v40 }
0x1188   :  { %v1404_v56 = vsel %vm43_vm0, %v1400_v55, 0.0 }
0x1189   :  { %v1401_v22 = vsel %vm43_vm0, %v1399_v11, 0.0 }
0x118a   :  { %1402 = vadd.xlane.f32.xlu0 %v1401_v22 }
0x118e   :  { %1405 = vadd.xlane.f32.xlu0 %v1404_v56 }
0x1217   :  { %v1403_v57 = vpop.xlane.xlu0 %1402 }
0x1218   :  { %v1407_v23 = vmul.f32 0.125, %v1403_v57 }
0x121a   :  { %v1409_v58 = vsub.f32 %v1399_v11, %v1407_v23 }
0x121b   :  { %v1406_v27 = vpop.xlane.xlu0 %1405 }
0x121c   :  { %v1408_v59 = vmul.f32 0.125, %v1406_v27  ;;  %v1411_v28 = vmul.f32 %v1409_v58, %v1409_v58 }
0x121e   :  { %v1410_v60 = vsub.f32 %v1400_v55, %v1408_v59  ;;  %v1413_v29 = vsel %vm43_vm0, %v1411_v28, 0.0 }
0x121f   :  { %1414 = vadd.xlane.f32.xlu0 %v1413_v29 }
0x1220   :  { %v1412_v61 = vmul.f32 %v1410_v60, %v1410_v60 }
0x1222   :  { %v1416_v32 = vsel %vm43_vm0, %v1412_v61, 0.0 }
0x1223   :  { %1417 = vadd.xlane.f32.xlu0 %v1416_v32 }
0x12ac   :  { %v1415_v62 = vpop.xlane.xlu0 %1414 }
0x12ad   :  { %v1419_v63 = vmul.f32 0.14285715, %v1415_v62 }
0x12af   :  { %v1421_v0 = vadd.f32 1e-12, %v1419_v63 }
0x12b0   :  { %v1418_v34 = vpop.xlane.xlu0 %1417 }
0x12b1   :  { %1900 = vrsqrt.f32 %v1421_v0  ;;  %v1420_v3 = vmul.f32 0.14285715, %v1418_v34 }
0x12b3   :  { %v1422_v7 = vadd.f32 1e-12, %v1420_v3 }
0x12b5   :  { %1902 = vrsqrt.f32 %v1422_v7 }
0x12bb   :  { %v1901_v37 = vpop.eup %1900 }
0x12bc   :  { %v1425_v33 = vmul.f32 %v1901_v37, %v1409_v58 }
0x12be   :  { %v1431_v12 = vmul.f32 %v1430_v26, %v1425_v33 }
0x12bf   :  { %v1903_v8 = vpop.eup %1902 }
0x12c0   :  { %v1426_v10 = vmul.f32 %v1903_v8, %v1410_v60  ;;  %v1437_v15 = vadd.f32 %v1436_v17, %v1431_v12 }
0x12c2   :  { %v1432_v18 = vmul.f32 %v1430_v26, %v1426_v10 }
0x12c4   :  { %v1438_v19 = vadd.f32 %v1436_v17, %v1432_v18 }
0x12c6   :  { %v1825_v21 = vpack.c.bf16 %v1438_v19, %v1437_v15 }
0x12c8   :  { %1826 = vmatpush3.bf16.msra.mxu0 %v1825_v21 }
0x12cb   :  { %1789 = vmatmul.mubr.msk.f32.vlgmr.msra.gmra.mrb[16].mxu0 %vm244_vm2, %v1439_v24 }
0x139e   :  { %v1509_v25 = vpop.f32.mrb[16].mxu0 }
0x139f   :  { %v1790_v31 = vpop.f32.mrb[17].mxu0  ;;  %1794 = vmatmul.mubr.msk.f32.vlgmr.msra.gmra.mrb[16].mxu1 %vm43_vm0, %v1509_v25 }
0x1472   :  { %v1587_v4 = vpop.f32.mrb[16].mxu1 }
0x1473   :  { %v1588_v38 = vadd.f32 %v1587_v4, %v1517_v14  ;;  %v1795_v16 = vpop.f32.mrb[17].mxu1 }
0x1475   :  { %1591 = vst [vmem:[#allocation5] sm:$0xff] %v1588_v38 }
0x1476   :  { %1937 = shalt.err (!%p1934_p12)
}
0x1477   :  { %s1938_s4 = scalar_lea.hbm %s2226_s2, 128 }
0x1478   :  { %p1939_p13 = scmp.ne.s32.totalorder %s2226_s2, %s1938_s4  ;;  %p1942_p0 = scmp.lt.u32.totalorder %s1938_s4, %s2226_s2 }
0x147a   :  { %p1944_p1 = pnand %p1942_p0, %p1939_p13 }
0x147c   :  { %1947 = shalt.err (!%p1944_p1)
}
0x147d   :  { %1601 = dma.vmem_to_hbm [thread:$0]  %s1599_s28, 128, %s2226_s2, [#allocation4]  }
0x147e   :  { %1950 = dma.done.wait [#allocation4], 128  }
0x147f   :  { %1951 = vsyncadd [#allocation4], 4294967168 }
0x1480   :  { %1605 = vsyncpa [#allocation3], 1 }
0x1481   :  { %1606 = vsyncpa [#allocation4], 1 }

</bundles_post_ra>
